<compile_context>
chip_gen: v6e
topology: v6e:2x2x1
jax: 0.10.0
libtpu: 0.0.40
codegen_flags: <defaults>
</compile_context>

<pallas_src>
import functools
import math

import jax
import jax.numpy as jnp
from jax import lax
from jax.experimental import pallas as pl
from jax.experimental.pallas import tpu as pltpu


# Per-layer LeakyReLU(0.2) flags (static; last ConvT layer has no activation,
# the tanh epilogue follows it inside the same kernel).
_ACT_FLAGS = (True, True, True, True, True, True, True, False)


# ----------------------------- Pallas kernel -------------------------------

def _generator_kernel(*refs, acts):
    """refs = (noise, w1, s1, ..., w8, s8, out).

    h_{i+1} = leaky_0.2( h_i @ W_i + shift_i )   (activation optional)
    out     = tanh((h_8 + noise) * 100) * 1.05
    Matmul operands are bf16 (MXU), accumulation + elementwise path is f32.
    """
    noise_ref = refs[0]
    out_ref = refs[-1]
    wrefs = refs[1:-1]

    x = noise_ref[...]                          # (B, nd) f32
    h = x
    for i, act in enumerate(acts):
        w = wrefs[2 * i][...]                   # (K, N) bf16, BN/bias folded
        s = wrefs[2 * i + 1][...]               # (1, N) f32
        h = jnp.dot(h.astype(jnp.bfloat16), w,
                    preferred_element_type=jnp.float32) + s
        if act:
            h = jnp.where(h > 0.0, h, 0.2 * h)

    out_ref[...] = jnp.tanh((h + x) * 100.0) * 1.05


def generator_conv_forward(params, noise):
    """noise: (B, noise_dim) -> (B, 1, noise_dim)."""
    B, nd = noise.shape
    flat = [noise.astype(jnp.float32)] + list(params["weights"])
    kernel = functools.partial(_generator_kernel, acts=_ACT_FLAGS)
    out = pl.pallas_call(
        kernel,
        out_shape=jax.ShapeDtypeStruct((B, nd), jnp.float32),
        in_specs=[pl.BlockSpec(memory_space=pltpu.MemorySpace.VMEM)] * len(flat),
        out_specs=pl.BlockSpec(memory_space=pltpu.MemorySpace.VMEM),
    )(*flat)
    return out.reshape(B, 1, nd)


# --------------------- init-time layer folding (plain JAX) ------------------

def _bn_fold(gamma, beta, mean, var, eps=1e-5):
    scale = gamma / jnp.sqrt(var + eps)
    shift = beta - mean * scale
    return scale, shift


def _conv2d_affine(xf, w, b, scale, shift, cin, hw):
    """Conv2d(valid)+bias+BN(eval), flat CHW in -> flat CHW out. xf:(N, cin*hw*hw)."""
    N = xf.shape[0]
    cout, _, kh, _ = w.shape
    ho = hw - kh + 1
    x = xf.reshape(N, cin, hw, hw)
    y = lax.conv_general_dilated(x, w, window_strides=(1, 1), padding="VALID",
                                 dimension_numbers=("NCHW", "OIHW", "NCHW"))
    y = (y + b.reshape(1, cout, 1, 1)) * scale.reshape(1, cout, 1, 1) \
        + shift.reshape(1, cout, 1, 1)
    return y.reshape(N, cout * ho * ho)


def _convt1d_affine(xf, w, b, scale, shift, cin, L, stride):
    """Periodic transposed 1D conv (+bias+BN eval), flat (C,L) in/out.

    xf: (N, cin*L); w: torch ConvTranspose1d weight (cin, cout, K).
    y[n, co, m] = sum_{ci,d} u[n, ci, (m-d) mod L*stride] * w[ci, co, d],
    where u is x zero-upsampled by `stride`.
    """
    N = xf.shape[0]
    _, cout, k = w.shape
    Lo = L * stride
    x = xf.reshape(N, cin, L)
    u = jnp.zeros((N, cin, Lo), xf.dtype).at[:, :, ::stride].set(x)
    y = jnp.zeros((N, cout, Lo), xf.dtype)
    for d in range(k):
        y = y + jnp.einsum("ncl,co->nol", jnp.roll(u, d, axis=2), w[:, :, d])
    y = (y + b.reshape(1, cout, 1)) * scale.reshape(1, cout, 1) \
        + shift.reshape(1, cout, 1)
    return y.reshape(N, cout * Lo)


def _linearize(fn, din):
    """fn is affine (N, din)->(N, dout).  Returns W (din, dout), shift (dout,)."""
    basis = jnp.concatenate(
        [jnp.zeros((1, din), jnp.float32), jnp.eye(din, dtype=jnp.float32)], axis=0)
    out = fn(basis)
    shift = out[0]
    W = out[1:] - shift[None, :]
    return W, shift


def init_params(key, noise_dims=64):
    dimen = int(math.sqrt(noise_dims))
    ks = 3
    F = (dimen - 2 * ks + 2) ** 2 * 12
    keys = iter(jax.random.split(key, 64))

    def nrm(shape, s=0.1):
        return jax.random.normal(next(keys), shape, jnp.float32) * s

    def bn(c):
        gamma = 1.0 + 0.1 * jax.random.normal(next(keys), (c,), jnp.float32)
        beta = 0.1 * jax.random.normal(next(keys), (c,), jnp.float32)
        mean = 0.1 * jax.random.normal(next(keys), (c,), jnp.float32)
        var = jax.random.uniform(next(keys), (c,), jnp.float32, 0.5, 1.5)
        return _bn_fold(gamma, beta, mean, var)

    weights = []

    def add(W, shift):
        weights.append(W.astype(jnp.bfloat16))
        weights.append(shift.reshape(1, -1).astype(jnp.float32))

    # --- conv1 block: Conv2d(1->6,3)+BN2d+LReLU, Conv2d(6->12,3)+BN2d+LReLU ---
    w1, b1 = nrm((6, 1, 3, 3)), nrm((6,))
    s1, t1 = bn(6)
    W, sh = _linearize(lambda x: _conv2d_affine(x, w1, b1, s1, t1, 1, dimen),
                       dimen * dimen)
    add(W, sh)

    h1 = dimen - 2
    w2, b2 = nrm((12, 6, 3, 3)), nrm((12,))
    s2, t2 = bn(12)
    W, sh = _linearize(lambda x: _conv2d_affine(x, w2, b2, s2, t2, 6, h1),
                       6 * h1 * h1)
    add(W, sh)   # output layout == torch NCHW flatten -> feeds FC directly

    # --- FC block: Linear(F,F)+LReLU+Dropout, Linear(F,2nd,no bias)+BN1d+LReLU ---
    fc1_w, fc1_b = nrm((F, F), 0.05), nrm((F,))
    add(fc1_w, fc1_b)
    nd2 = noise_dims * 2
    fc2_w = nrm((F, nd2), 0.05)
    s, t = bn(nd2)
    add(fc2_w * s[None, :], t)           # BN folded into the (no-bias) linear

    # --- CONV stack: periodic ConvTranspose1d_meta layers ---
    L = nd2 // 16
    ct_cfg = [(16, 16, 5, 2, False, True),
              (16, 8, 5, 2, False, True),
              (8, 4, 5, 2, False, True),
              (4, 1, 5, 1, True, False)]
    for cin, cout, k, stride, use_bias, use_bn in ct_cfg:
        wt = nrm((cin, cout, k))
        bias = nrm((cout,)) if use_bias else jnp.zeros((cout,), jnp.float32)
        if use_bn:
            s, t = bn(cout)
        else:
            s = jnp.ones((cout,), jnp.float32)
            t = jnp.zeros((cout,), jnp.float32)
        W, sh = _linearize(
            lambda x, wt=wt, bias=bias, s=s, t=t, cin=cin, L=L, stride=stride:
                _convt1d_affine(x, wt, bias, s, t, cin, L, stride),
            cin * L)
        add(W, sh)
        L = L * stride

    assert len(weights) == 2 * len(_ACT_FLAGS)
    return {"weights": weights, "dimen": dimen, "noise_dim": noise_dims}


# --------------------------------- main -------------------------------------

if __name__ == "__main__":
    key = jax.random.PRNGKey(0)
    pkey, nkey = jax.random.split(key)

    noise_dims = 64            # dimen = 8; noise_dim*2/16 = 8; all constraints hold
    batch = 4

    params = init_params(pkey, noise_dims=noise_dims)
    noise = jax.random.normal(nkey, (batch, noise_dims), jnp.float32)

    fwd = jax.jit(lambda w, n: generator_conv_forward({"weights": w}, n))
    out = fwd(params["weights"], noise)
    out = jax.block_until_ready(out)

    assert out.shape == (batch, 1, noise_dims), out.shape
    assert bool(jnp.all(jnp.isfinite(out)))
    assert bool(jnp.all(jnp.abs(out) <= 1.05 + 1e-5))
    print("KERNEL_OK")
</pallas_src>

<mosaic_0001>
module attributes {stable_mosaic.version = 11 : i64} {
  func.func @_generator_kernel(%arg0: memref<4x64xf32, #tpu.memory_space<vmem>>, %arg1: memref<64x216xbf16, #tpu.memory_space<vmem>>, %arg2: memref<1x216xf32, #tpu.memory_space<vmem>>, %arg3: memref<216x192xbf16, #tpu.memory_space<vmem>>, %arg4: memref<1x192xf32, #tpu.memory_space<vmem>>, %arg5: memref<192x192xbf16, #tpu.memory_space<vmem>>, %arg6: memref<1x192xf32, #tpu.memory_space<vmem>>, %arg7: memref<192x128xbf16, #tpu.memory_space<vmem>>, %arg8: memref<1x128xf32, #tpu.memory_space<vmem>>, %arg9: memref<128x256xbf16, #tpu.memory_space<vmem>>, %arg10: memref<1x256xf32, #tpu.memory_space<vmem>>, %arg11: memref<256x256xbf16, #tpu.memory_space<vmem>>, %arg12: memref<1x256xf32, #tpu.memory_space<vmem>>, %arg13: memref<256x256xbf16, #tpu.memory_space<vmem>>, %arg14: memref<1x256xf32, #tpu.memory_space<vmem>>, %arg15: memref<256x64xbf16, #tpu.memory_space<vmem>>, %arg16: memref<1x64xf32, #tpu.memory_space<vmem>>, %arg17: memref<4x64xf32, #tpu.memory_space<vmem>>) attributes {dimension_semantics = [], scalar_prefetch = 0 : i64, scratch_operands = 0 : i64, tpu.core_type = #tpu.core_type<tc>} {
    %c0 = arith.constant 0 : index
    %c0_0 = arith.constant 0 : index
    %0 = vector.load %arg0[%c0, %c0_0] : memref<4x64xf32, #tpu.memory_space<vmem>>, vector<4x64xf32>
    %c0_1 = arith.constant 0 : index
    %c0_2 = arith.constant 0 : index
    %1 = vector.load %arg1[%c0_1, %c0_2] : memref<64x216xbf16, #tpu.memory_space<vmem>>, vector<64x216xbf16>
    %c0_3 = arith.constant 0 : index
    %c0_4 = arith.constant 0 : index
    %2 = vector.load %arg2[%c0_3, %c0_4] : memref<1x216xf32, #tpu.memory_space<vmem>>, vector<1x216xf32>
    %3 = arith.truncf %0 : vector<4x64xf32> to vector<4x64xbf16>
    %cst = arith.constant dense<0.000000e+00> : vector<4x216xf32>
    %4 = tpu.matmul %3, %1, %cst {dimension_numbers = #tpu.dot_dimension_numbers<[1], [0], [0], [1], [0, 0, 1, 1], [], []>} : vector<4x64xbf16>, vector<64x216xbf16>, vector<4x216xf32> -> vector<4x216xf32>
    %5 = vector.broadcast %2 : vector<1x216xf32> to vector<4x216xf32>
    %6 = arith.addf %4, %5 : vector<4x216xf32>
    %cst_5 = arith.constant 0.000000e+00 : f32
    %7 = vector.broadcast %cst_5 : f32 to vector<4x216xf32>
    %8 = arith.cmpf ogt, %6, %7 : vector<4x216xf32>
    %cst_6 = arith.constant 2.000000e-01 : f32
    %9 = vector.broadcast %cst_6 : f32 to vector<4x216xf32>
    %10 = arith.mulf %9, %6 : vector<4x216xf32>
    %11 = arith.select %8, %6, %10 : vector<4x216xi1>, vector<4x216xf32>
    %c0_7 = arith.constant 0 : index
    %c0_8 = arith.constant 0 : index
    %12 = vector.load %arg3[%c0_7, %c0_8] : memref<216x192xbf16, #tpu.memory_space<vmem>>, vector<216x192xbf16>
    %c0_9 = arith.constant 0 : index
    %c0_10 = arith.constant 0 : index
    %13 = vector.load %arg4[%c0_9, %c0_10] : memref<1x192xf32, #tpu.memory_space<vmem>>, vector<1x192xf32>
    %14 = arith.truncf %11 : vector<4x216xf32> to vector<4x216xbf16>
    %cst_11 = arith.constant dense<0.000000e+00> : vector<4x192xf32>
    %15 = tpu.matmul %14, %12, %cst_11 {dimension_numbers = #tpu.dot_dimension_numbers<[1], [0], [0], [1], [0, 0, 1, 1], [], []>} : vector<4x216xbf16>, vector<216x192xbf16>, vector<4x192xf32> -> vector<4x192xf32>
    %16 = vector.broadcast %13 : vector<1x192xf32> to vector<4x192xf32>
    %17 = arith.addf %15, %16 : vector<4x192xf32>
    %cst_12 = arith.constant 0.000000e+00 : f32
    %18 = vector.broadcast %cst_12 : f32 to vector<4x192xf32>
    %19 = arith.cmpf ogt, %17, %18 : vector<4x192xf32>
    %cst_13 = arith.constant 2.000000e-01 : f32
    %20 = vector.broadcast %cst_13 : f32 to vector<4x192xf32>
    %21 = arith.mulf %20, %17 : vector<4x192xf32>
    %22 = arith.select %19, %17, %21 : vector<4x192xi1>, vector<4x192xf32>
    %c0_14 = arith.constant 0 : index
    %c0_15 = arith.constant 0 : index
    %23 = vector.load %arg5[%c0_14, %c0_15] : memref<192x192xbf16, #tpu.memory_space<vmem>>, vector<192x192xbf16>
    %c0_16 = arith.constant 0 : index
    %c0_17 = arith.constant 0 : index
    %24 = vector.load %arg6[%c0_16, %c0_17] : memref<1x192xf32, #tpu.memory_space<vmem>>, vector<1x192xf32>
    %25 = arith.truncf %22 : vector<4x192xf32> to vector<4x192xbf16>
    %cst_18 = arith.constant dense<0.000000e+00> : vector<4x192xf32>
    %26 = tpu.matmul %25, %23, %cst_18 {dimension_numbers = #tpu.dot_dimension_numbers<[1], [0], [0], [1], [0, 0, 1, 1], [], []>} : vector<4x192xbf16>, vector<192x192xbf16>, vector<4x192xf32> -> vector<4x192xf32>
    %27 = vector.broadcast %24 : vector<1x192xf32> to vector<4x192xf32>
    %28 = arith.addf %26, %27 : vector<4x192xf32>
    %cst_19 = arith.constant 0.000000e+00 : f32
    %29 = vector.broadcast %cst_19 : f32 to vector<4x192xf32>
    %30 = arith.cmpf ogt, %28, %29 : vector<4x192xf32>
    %cst_20 = arith.constant 2.000000e-01 : f32
    %31 = vector.broadcast %cst_20 : f32 to vector<4x192xf32>
    %32 = arith.mulf %31, %28 : vector<4x192xf32>
    %33 = arith.select %30, %28, %32 : vector<4x192xi1>, vector<4x192xf32>
    %c0_21 = arith.constant 0 : index
    %c0_22 = arith.constant 0 : index
    %34 = vector.load %arg7[%c0_21, %c0_22] : memref<192x128xbf16, #tpu.memory_space<vmem>>, vector<192x128xbf16>
    %c0_23 = arith.constant 0 : index
    %c0_24 = arith.constant 0 : index
    %35 = vector.load %arg8[%c0_23, %c0_24] : memref<1x128xf32, #tpu.memory_space<vmem>>, vector<1x128xf32>
    %36 = arith.truncf %33 : vector<4x192xf32> to vector<4x192xbf16>
    %cst_25 = arith.constant dense<0.000000e+00> : vector<4x128xf32>
    %37 = tpu.matmul %36, %34, %cst_25 {dimension_numbers = #tpu.dot_dimension_numbers<[1], [0], [0], [1], [0, 0, 1, 1], [], []>} : vector<4x192xbf16>, vector<192x128xbf16>, vector<4x128xf32> -> vector<4x128xf32>
    %38 = vector.broadcast %35 : vector<1x128xf32> to vector<4x128xf32>
    %39 = arith.addf %37, %38 : vector<4x128xf32>
    %cst_26 = arith.constant 0.000000e+00 : f32
    %40 = vector.broadcast %cst_26 : f32 to vector<4x128xf32>
    %41 = arith.cmpf ogt, %39, %40 : vector<4x128xf32>
    %cst_27 = arith.constant 2.000000e-01 : f32
    %42 = vector.broadcast %cst_27 : f32 to vector<4x128xf32>
    %43 = arith.mulf %42, %39 : vector<4x128xf32>
    %44 = arith.select %41, %39, %43 : vector<4x128xi1>, vector<4x128xf32>
    %c0_28 = arith.constant 0 : index
    %c0_29 = arith.constant 0 : index
    %45 = vector.load %arg9[%c0_28, %c0_29] : memref<128x256xbf16, #tpu.memory_space<vmem>>, vector<128x256xbf16>
    %c0_30 = arith.constant 0 : index
    %c0_31 = arith.constant 0 : index
    %46 = vector.load %arg10[%c0_30, %c0_31] : memref<1x256xf32, #tpu.memory_space<vmem>>, vector<1x256xf32>
    %47 = arith.truncf %44 : vector<4x128xf32> to vector<4x128xbf16>
    %cst_32 = arith.constant dense<0.000000e+00> : vector<4x256xf32>
    %48 = tpu.matmul %47, %45, %cst_32 {dimension_numbers = #tpu.dot_dimension_numbers<[1], [0], [0], [1], [0, 0, 1, 1], [], []>} : vector<4x128xbf16>, vector<128x256xbf16>, vector<4x256xf32> -> vector<4x256xf32>
    %49 = vector.broadcast %46 : vector<1x256xf32> to vector<4x256xf32>
    %50 = arith.addf %48, %49 : vector<4x256xf32>
    %cst_33 = arith.constant 0.000000e+00 : f32
    %51 = vector.broadcast %cst_33 : f32 to vector<4x256xf32>
    %52 = arith.cmpf ogt, %50, %51 : vector<4x256xf32>
    %cst_34 = arith.constant 2.000000e-01 : f32
    %53 = vector.broadcast %cst_34 : f32 to vector<4x256xf32>
    %54 = arith.mulf %53, %50 : vector<4x256xf32>
    %55 = arith.select %52, %50, %54 : vector<4x256xi1>, vector<4x256xf32>
    %c0_35 = arith.constant 0 : index
    %c0_36 = arith.constant 0 : index
    %56 = vector.load %arg11[%c0_35, %c0_36] : memref<256x256xbf16, #tpu.memory_space<vmem>>, vector<256x256xbf16>
    %c0_37 = arith.constant 0 : index
    %c0_38 = arith.constant 0 : index
    %57 = vector.load %arg12[%c0_37, %c0_38] : memref<1x256xf32, #tpu.memory_space<vmem>>, vector<1x256xf32>
    %58 = arith.truncf %55 : vector<4x256xf32> to vector<4x256xbf16>
    %cst_39 = arith.constant dense<0.000000e+00> : vector<4x256xf32>
    %59 = tpu.matmul %58, %56, %cst_39 {dimension_numbers = #tpu.dot_dimension_numbers<[1], [0], [0], [1], [0, 0, 1, 1], [], []>} : vector<4x256xbf16>, vector<256x256xbf16>, vector<4x256xf32> -> vector<4x256xf32>
    %60 = vector.broadcast %57 : vector<1x256xf32> to vector<4x256xf32>
    %61 = arith.addf %59, %60 : vector<4x256xf32>
    %cst_40 = arith.constant 0.000000e+00 : f32
    %62 = vector.broadcast %cst_40 : f32 to vector<4x256xf32>
    %63 = arith.cmpf ogt, %61, %62 : vector<4x256xf32>
    %cst_41 = arith.constant 2.000000e-01 : f32
    %64 = vector.broadcast %cst_41 : f32 to vector<4x256xf32>
    %65 = arith.mulf %64, %61 : vector<4x256xf32>
    %66 = arith.select %63, %61, %65 : vector<4x256xi1>, vector<4x256xf32>
    %c0_42 = arith.constant 0 : index
    %c0_43 = arith.constant 0 : index
    %67 = vector.load %arg13[%c0_42, %c0_43] : memref<256x256xbf16, #tpu.memory_space<vmem>>, vector<256x256xbf16>
    %c0_44 = arith.constant 0 : index
    %c0_45 = arith.constant 0 : index
    %68 = vector.load %arg14[%c0_44, %c0_45] : memref<1x256xf32, #tpu.memory_space<vmem>>, vector<1x256xf32>
    %69 = arith.truncf %66 : vector<4x256xf32> to vector<4x256xbf16>
    %cst_46 = arith.constant dense<0.000000e+00> : vector<4x256xf32>
    %70 = tpu.matmul %69, %67, %cst_46 {dimension_numbers = #tpu.dot_dimension_numbers<[1], [0], [0], [1], [0, 0, 1, 1], [], []>} : vector<4x256xbf16>, vector<256x256xbf16>, vector<4x256xf32> -> vector<4x256xf32>
    %71 = vector.broadcast %68 : vector<1x256xf32> to vector<4x256xf32>
    %72 = arith.addf %70, %71 : vector<4x256xf32>
    %cst_47 = arith.constant 0.000000e+00 : f32
    %73 = vector.broadcast %cst_47 : f32 to vector<4x256xf32>
    %74 = arith.cmpf ogt, %72, %73 : vector<4x256xf32>
    %cst_48 = arith.constant 2.000000e-01 : f32
    %75 = vector.broadcast %cst_48 : f32 to vector<4x256xf32>
    %76 = arith.mulf %75, %72 : vector<4x256xf32>
    %77 = arith.select %74, %72, %76 : vector<4x256xi1>, vector<4x256xf32>
    %c0_49 = arith.constant 0 : index
    %c0_50 = arith.constant 0 : index
    %78 = vector.load %arg15[%c0_49, %c0_50] : memref<256x64xbf16, #tpu.memory_space<vmem>>, vector<256x64xbf16>
    %c0_51 = arith.constant 0 : index
    %c0_52 = arith.constant 0 : index
    %79 = vector.load %arg16[%c0_51, %c0_52] : memref<1x64xf32, #tpu.memory_space<vmem>>, vector<1x64xf32>
    %80 = arith.truncf %77 : vector<4x256xf32> to vector<4x256xbf16>
    %cst_53 = arith.constant dense<0.000000e+00> : vector<4x64xf32>
    %81 = tpu.matmul %80, %78, %cst_53 {dimension_numbers = #tpu.dot_dimension_numbers<[1], [0], [0], [1], [0, 0, 1, 1], [], []>} : vector<4x256xbf16>, vector<256x64xbf16>, vector<4x64xf32> -> vector<4x64xf32>
    %82 = vector.broadcast %79 : vector<1x64xf32> to vector<4x64xf32>
    %83 = arith.addf %81, %82 : vector<4x64xf32>
    %84 = arith.addf %83, %0 : vector<4x64xf32>
    %cst_54 = arith.constant 1.000000e+02 : f32
    %85 = vector.broadcast %cst_54 : f32 to vector<4x64xf32>
    %86 = arith.mulf %84, %85 : vector<4x64xf32>
    %87 = math.tanh %86 : vector<4x64xf32>
    %cst_55 = arith.constant 1.050000e+00 : f32
    %88 = vector.broadcast %cst_55 : f32 to vector<4x64xf32>
    %89 = arith.mulf %87, %88 : vector<4x64xf32>
    %c0_56 = arith.constant 0 : index
    %c0_57 = arith.constant 0 : index
    %90 = vector.load %arg17[%c0_56, %c0_57] : memref<4x64xf32, #tpu.memory_space<vmem>>, vector<4x64xf32>
    tpu.vector_store %arg17[%c0_56, %c0_57], %89 {strides = array<i32>} : memref<4x64xf32, #tpu.memory_space<vmem>>, vector<4x64xf32>,
    return
  }
}

</mosaic_0001>

<bundles_post_ra>
// kernel: _lambda_.1
= control target key start
LH: loop header
LB: loop body
LE: loop exit
PB: predicated region body
PF: predicated region fallthrough
CT: control target
= control target key end

     0   :  { %s2717_s0 = inlined_call_operand.vmem [shape: f32[4,64], index: 0, kind: input, shape index: {}]   ;;  %s2718_s1 = inlined_call_operand.vmem [shape: bf16[64,216], index: 1, kind: input, shape index: {}]   ;;  %s2719_s2 = inlined_call_operand.vmem [shape: f32[1,216], index: 2, kind: input, shape index: {}]   ;;  %s2720_s3 = inlined_call_operand.vmem [shape: bf16[216,192], index: 3, kind: input, shape index: {}]   ;;  %s2721_s4 = inlined_call_operand.vmem [shape: f32[1,192], index: 4, kind: input, shape index: {}]   ;;  %s2722_s5 = inlined_call_operand.hbm [shape: bf16[192,192], index: 5, kind: input, shape index: {}]   ;;  %s2723_s6 = inlined_call_operand.vmem [shape: f32[1,192], index: 6, kind: input, shape index: {}]   ;;  %s2724_s7 = inlined_call_operand.hbm [shape: bf16[192,128], index: 7, kind: input, shape index: {}]   ;;  %s2725_s8 = inlined_call_operand.vmem [shape: f32[1,128], index: 8, kind: input, shape index: {}]   ;;  %s2726_s9 = inlined_call_operand.hbm [shape: bf16[128,256], index: 9, kind: input, shape index: {}]   ;;  %s2727_s10 = inlined_call_operand.vmem [shape: f32[1,256], index: 10, kind: input, shape index: {}]   ;;  %s2728_s11 = inlined_call_operand.vmem [shape: bf16[256,256], index: 11, kind: input, shape index: {}]   ;;  %s2729_s12 = inlined_call_operand.vmem [shape: f32[1,256], index: 12, kind: input, shape index: {}]   ;;  %s2730_s13 = inlined_call_operand.vmem [shape: bf16[256,256], index: 13, kind: input, shape index: {}]   ;;  %s2731_s14 = inlined_call_operand.vmem [shape: f32[1,256], index: 14, kind: input, shape index: {}]   ;;  %s2732_s15 = inlined_call_operand.vmem [shape: bf16[256,64], index: 15, kind: input, shape index: {}]   ;;  %s2733_s16 = inlined_call_operand.vmem [shape: f32[1,64], index: 16, kind: input, shape index: {}]   ;;  %s2734_s17 = inlined_call_operand.hbm [shape: f32[4,64], index: 17, kind: output, shape index: {}]  }
   0x1   :  { %2737 = sst [smem:[#allocation12_spill]] %s2717_s0 }
   0x2   :  { %2738 = sst [smem:[#allocation13_spill]] %s2718_s1 }
   0x3   :  { %22 = vsyncpa [#allocation3], 0 }
   0x4   :  { %23 = vsyncpa [#allocation6], 0 }
   0x5   :  { %24 = vsyncpa [#allocation4], 0  ;;  %s2198_s24 = smov [#allocation5]  }
   0x6   :  { %s54_s25 = sshll.u32 %s2198_s24, 4  ;;  %s55_s25 = int_to_ptr.vmem [resolvable:$true] %s54_s25 }
   0x7   :  { %s2120_s26 = scalar_lea.vmem %s55_s25, 1536  ;;  %p2125_p1 = scmp.lt.s32.totalorder %s55_s25, %s55_s25 }
   0x8   :  { %p2121_p0 = scmp.ne.s32.totalorder %s55_s25, %s2120_s26  ;;  %p2126_p2 = scmp.lt.s32.totalorder %s2120_s26, %s2120_s26 }
   0xa   :  { %p2127_p3 = por %p2126_p2, %p2125_p1 }
   0xc   :  { %p2128_p4 = pnand %p2127_p3, %p2121_p0 }
   0xe   :  { %2131 = shalt.err (!%p2128_p4)
}
   0xf   :  { %s2199_s27 = smov 64   ;;  %s2200_s28 = smov 4  }
  0x10   :  { %60 = dma.hbm_to_vmem [thread:$0]  %s2724_s7, 1536, %s55_s25, [#allocation6], %s2199_s27, %s2199_s27, %s2200_s28  }
  0x11   :  { %s2201_s30 = smov [#allocation2]  }
  0x12   :  { %s40_s18 = sshll.u32 %s2201_s30, 4  ;;  %s41_s18 = int_to_ptr.vmem [resolvable:$true] %s40_s18 }
  0x13   :  { %s2140_s19 = scalar_lea.vmem %s41_s18, 3072  ;;  %p2145_p6 = scmp.lt.s32.totalorder %s41_s18, %s41_s18 }
  0x14   :  { %p2141_p5 = scmp.ne.s32.totalorder %s41_s18, %s2140_s19  ;;  %p2146_p7 = scmp.lt.s32.totalorder %s2140_s19, %s2140_s19 }
  0x16   :  { %p2147_p8 = por %p2146_p7, %p2145_p6 }
  0x18   :  { %p2148_p9 = pnand %p2147_p8, %p2141_p5 }
  0x1a   :  { %2151 = shalt.err (!%p2148_p9)
}
  0x1b   :  { %s2202_s1 = smov 128   ;;  %s2203_s20 = smov 8  }
  0x1c   :  { %46 = dma.hbm_to_vmem [thread:$0]  %s2722_s5, 3072, %s41_s18, [#allocation3], %s2202_s1, %s2202_s1, %s2203_s20  }
  0x1d   :  { %s2204_s23 = smov [#allocation7]  }
  0x1e   :  { %s68_s24 = sshll.u32 %s2204_s23, 4  ;;  %s69_s24 = int_to_ptr.vmem [resolvable:$true] %s68_s24 }
  0x1f   :  { %s2160_s7 = scalar_lea.vmem %s69_s24, 2048  ;;  %p2165_p11 = scmp.lt.s32.totalorder %s69_s24, %s69_s24 }
  0x20   :  { %p2161_p10 = scmp.ne.s32.totalorder %s69_s24, %s2160_s7  ;;  %p2166_p12 = scmp.lt.s32.totalorder %s2160_s7, %s2160_s7 }
  0x22   :  { %p2167_p13 = por %p2166_p12, %p2165_p11 }
  0x24   :  { %p2168_p0 = pnand %p2167_p13, %p2161_p10 }
  0x26   :  { %2171 = shalt.err (!%p2168_p0)
}
  0x27   :  { %74 = dma.hbm_to_vmem [thread:$0]  %s2726_s9, 2048, %s69_s24, [#allocation6], %s2202_s1, %s2202_s1, %s2203_s20  }
  0x28   :  { %2192 = dma.done.wait [#allocation3], 3072  }
  0x29   :  { %2193 = vsyncadd [#allocation3], 4294964224 }
  0x2a   :  { %2194 = dma.done.wait [#allocation6], 3584  }
  0x2b   :  { %2195 = vsyncadd [#allocation6], 4294963712  ;;  %v2205_v0 = vmov 0   ;;  %s2739_s28 = sld [smem:[#allocation13_spill]]  ;;  %v1886_v10 = vld [vmem:[%s2720_s3 + $0x74] ss:$8 sps:$4 sm:$0xff]   ;;  %v111_v60 = vlaneseq }
  0x2c   :  { %197 = vmatprep.mubr.bf16.mxu1 %v2205_v0  ;;  %s2740_s27 = sld [smem:[#allocation12_spill]]  ;;  %vm161_vm0 = vcmask 523264   ;;  %v1884_v12 = vld [vmem:[%s2720_s3 + $0x70] ss:$8 sps:$4 sm:$0xff]   ;;  %v1889_v13 = vld [vmem:[%s2720_s3 + $0x64] ss:$8 sps:$4 sm:$0xff]  }
  0x2d   :  { %v1887_v14 = vld [vmem:[%s2720_s3 + $0x60] ss:$8 sps:$4 sm:$0xff]   ;;  %v1892_v15 = vld [vmem:[%s2720_s3 + $0x54] ss:$8 sps:$4 sm:$0xff]   ;;  %v1890_v16 = vld [vmem:[%s2720_s3 + $0x50] ss:$8 sps:$4 sm:$0xff]  }
  0x2e   :  { %v1895_v17 = vld [vmem:[%s2720_s3 + $0x44] ss:$8 sps:$4 sm:$0xff]   ;;  %v1893_v18 = vld [vmem:[%s2720_s3 + $0x40] ss:$8 sps:$4 sm:$0xff]   ;;  %v1898_v19 = vld [vmem:[%s2720_s3 + $0x34] ss:$8 sps:$4 sm:$0xff]  }
  0x2f   :  { %v1896_v20 = vld [vmem:[%s2720_s3 + $0x30] ss:$8 sps:$4 sm:$0xff]   ;;  %v1901_v21 = vld [vmem:[%s2720_s3 + $0x24] ss:$8 sps:$4 sm:$0xff]   ;;  %v1899_v22 = vld [vmem:[%s2720_s3 + $0x20] ss:$8 sps:$4 sm:$0xff]  }
  0x30   :  { %v1904_v23 = vld [vmem:[%s2720_s3 + $0x14] ss:$8 sps:$4 sm:$0xff]   ;;  %v1902_v24 = vld [vmem:[%s2720_s3 + $0x10] ss:$8 sps:$4 sm:$0xff]   ;;  %v1907_v25 = vld [vmem:[%s2720_s3 + $0x4] ss:$8 sps:$4 sm:$0xff]  }
  0x31   :  { %v1872_v1 = vld [vmem:[%s2739_s28 + $0x34] ss:$8 sps:$4 sm:$0xff]   ;;  %v1874_v2 = vld [vmem:[%s2739_s28 + $0x30] ss:$8 sps:$4 sm:$0xff]   ;;  %v1875_v3 = vld [vmem:[%s2739_s28 + $0x24] ss:$8 sps:$4 sm:$0xff]  }
  0x32   :  { %173 = vmatprep.subr.bf16.mxu1 %v1872_v1  ;;  %v1877_v4 = vld [vmem:[%s2739_s28 + $0x20] ss:$8 sps:$4 sm:$0xff]   ;;  %v1878_v5 = vld [vmem:[%s2739_s28 + $0x14] ss:$8 sps:$4 sm:$0xff]   ;;  %v1880_v6 = vld [vmem:[%s2739_s28 + $0x10] ss:$8 sps:$4 sm:$0xff]  }
  0x33   :  { %174 = vmatpush1.bf16.msra.mxu1 %v1874_v2  ;;  %v1881_v7 = vld [vmem:[%s2739_s28 + $0x4] ss:$8 sps:$4 sm:$0xff]   ;;  %v1883_v8 = vld [vmem:[%s2739_s28] ss:$8 sps:$4 sm:$0xff]   ;;  %v238_v26 = vld [vmem:[%s2720_s3 + $0xd0] sm:$0xff]  ;;  %vm392_vm1 = vcmask 1043456  }
  0x34   :  { %175 = vmatprep.subr.bf16.mxu1 %v1875_v3  ;;  %v99_v9 = vld [vmem:[%s2740_s27] sm:$0xf]  ;;  %v1702_v28 = vcombine.high %v238_v26, %v238_v26  ;;  %v1701_v29 = vcombine.low %v238_v26, %v238_v26  ;;  %v1912_v30 = vld [vmem:[%s2720_s3 + $0xc4] ss:$8 sps:$4 sm:$0xff]   ;;  %v1915_v33 = vld [vmem:[%s2720_s3 + $0xb4] ss:$8 sps:$4 sm:$0xff]  }
  0x35   :  { %v109_v11 = vpack.c.bf16 %v99_v9, %v99_v9  ;;  %v1905_v27 = vld [vmem:[%s2720_s3] ss:$8 sps:$4 sm:$0xff]   ;;  %v1913_v34 = vld [vmem:[%s2720_s3 + $0xb0] ss:$8 sps:$4 sm:$0xff]   ;;  %v1918_v35 = vld [vmem:[%s2720_s3 + $0xa4] ss:$8 sps:$4 sm:$0xff]  }
  0x36   :  { %v394_v31 = vsel %vm392_vm1, %v1701_v29, 0  ;;  %v1910_v32 = vld [vmem:[%s2720_s3 + $0xc0] ss:$8 sps:$4 sm:$0xff]   ;;  %v1921_v37 = vld [vmem:[%s2720_s3 + $0x94] ss:$8 sps:$4 sm:$0xff]   ;;  %v112_v61 = vshrl.u32 %v111_v60, 7 }
  0x37   :  { %176 = vmatpush1.bf16.msra.mxu1 %v1877_v4  ;;  %v1916_v36 = vld [vmem:[%s2720_s3 + $0xa0] ss:$8 sps:$4 sm:$0xff]   ;;  %v1919_v38 = vld [vmem:[%s2720_s3 + $0x90] ss:$8 sps:$4 sm:$0xff]   ;;  %v1924_v39 = vld [vmem:[%s2720_s3 + $0x84] ss:$8 sps:$4 sm:$0xff]  }
  0x38   :  { %177 = vmatprep.subr.bf16.mxu1 %v1878_v5  ;;  %v1922_v40 = vld [vmem:[%s2720_s3 + $0x80] ss:$8 sps:$4 sm:$0xff]   ;;  %v1925_v41 = vld [vmem:[#allocation2 + $0x74] ss:$8 sps:$4 sm:$0xff]   ;;  %v1927_v42 = vld [vmem:[#allocation2 + $0x70] ss:$8 sps:$4 sm:$0xff]  }
  0x39   :  { %v1928_v43 = vld [vmem:[#allocation2 + $0x64] ss:$8 sps:$4 sm:$0xff]   ;;  %607 = vmatprep.subr.bf16.mxu0 %v1925_v41  ;;  %v1930_v44 = vld [vmem:[#allocation2 + $0x60] ss:$8 sps:$4 sm:$0xff]   ;;  %v1931_v45 = vld [vmem:[#allocation2 + $0x54] ss:$8 sps:$4 sm:$0xff]  }
  0x3a   :  { %608 = vmatpush1.bf16.msra.mxu0 %v1927_v42  ;;  %v1933_v46 = vld [vmem:[#allocation2 + $0x50] ss:$8 sps:$4 sm:$0xff]   ;;  %v1934_v47 = vld [vmem:[#allocation2 + $0x44] ss:$8 sps:$4 sm:$0xff]   ;;  %v1936_v48 = vld [vmem:[#allocation2 + $0x40] ss:$8 sps:$4 sm:$0xff]  }
  0x3b   :  { %178 = vmatpush1.bf16.msra.mxu1 %v1880_v6  ;;  %609 = vmatprep.subr.bf16.mxu0 %v1928_v43  ;;  %v1937_v49 = vld [vmem:[#allocation2 + $0x34] ss:$8 sps:$4 sm:$0xff]   ;;  %v1939_v50 = vld [vmem:[#allocation2 + $0x30] ss:$8 sps:$4 sm:$0xff]   ;;  %v1940_v51 = vld [vmem:[#allocation2 + $0x24] ss:$8 sps:$4 sm:$0xff]  }
  0x3c   :  { %179 = vmatprep.subr.bf16.mxu1 %v1881_v7  ;;  %v1942_v52 = vld [vmem:[#allocation2 + $0x20] ss:$8 sps:$4 sm:$0xff]   ;;  %v1943_v53 = vld [vmem:[#allocation2 + $0x14] ss:$8 sps:$4 sm:$0xff]   ;;  %v1945_v54 = vld [vmem:[#allocation2 + $0x10] ss:$8 sps:$4 sm:$0xff]  }
  0x3d   :  { %v1946_v55 = vld [vmem:[#allocation2 + $0x4] ss:$8 sps:$4 sm:$0xff]   ;;  %v1948_v56 = vld [vmem:[#allocation2] ss:$8 sps:$4 sm:$0xff]   ;;  %v1949_v57 = vld [vmem:[#allocation2 + $0xb4] ss:$8 sps:$4 sm:$0xff]  }
  0x3e   :  { %610 = vmatpush1.bf16.msra.mxu0 %v1930_v44  ;;  %v1951_v58 = vld [vmem:[#allocation2 + $0xb0] ss:$8 sps:$4 sm:$0xff]   ;;  %v1952_v59 = vld [vmem:[#allocation2 + $0xa4] ss:$8 sps:$4 sm:$0xff]   ;;  %v2417_v62 = vsub.s32 0, %v112_v61  ;;  %v2422_v1 = vsub.s32 1, %v112_v61 }
  0x3f   :  { %180 = vmatpush1.bf16.msra.mxu1 %v1883_v8  ;;  %611 = vmatprep.subr.bf16.mxu0 %v1931_v45  ;;  %v108_v63 = vld [vmem:[%s2719_s2] sm:$0x3]  ;;  %vm388_vm4 = vcmask 719872   ;;  %v1966_v26 = vld [vmem:[#allocation5 + $0x10] sm:$0xff]   ;;  %v1969_v29 = vld [vmem:[#allocation5 + $0x58] sm:$0xff]   ;;  %s2206_s24 = smov [#allocation8]  }
  0x40   :  { %399 = vmatprep.subr.bf16.mxu1 %v1886_v10  ;;  %v114_v2 = vrot.slane %v108_v63, %v2417_v62  ;;  %v118_v3 = vrot.slane %v108_v63, %v2422_v1  ;;  %v1970_v45 = vld [vmem:[#allocation5 + $0x50] sm:$0xff]  }
  0x42   :  { %1674 = vmatmul.mubr.msk.bf16.vlgmr.msra.gmra.mxu1 %vm161_vm0, %v109_v11  ;;  %612 = vmatpush1.bf16.msra.mxu0 %v1933_v46  ;;  %v1971_v46 = vld [vmem:[#allocation5 + $0x48] sm:$0xff]  }
  0x43   :  { %400 = vmatpush1.bf16.msra.mxu1 %v1884_v12  ;;  %613 = vmatprep.subr.bf16.mxu0 %v1934_v47  ;;  %v1972_v47 = vld [vmem:[#allocation5 + $0x40] sm:$0xff]  }
  0x44   :  { %401 = vmatprep.subr.bf16.mxu1 %v1889_v13 }
  0x46   :  { %614 = vmatpush1.bf16.msra.mxu0 %v1936_v48  ;;  %v1973_v48 = vld [vmem:[#allocation7 + $0x70] ss:$8 sps:$4 sm:$0xff]  }
  0x47   :  { %402 = vmatpush1.bf16.msra.mxu1 %v1887_v14  ;;  %615 = vmatprep.subr.bf16.mxu0 %v1937_v49  ;;  %v1975_v49 = vld [vmem:[#allocation7 + $0x74] ss:$8 sps:$4 sm:$0xff]  }
  0x48   :  { %403 = vmatprep.subr.bf16.mxu1 %v1892_v15 }
  0x4a   :  { %616 = vmatpush1.bf16.msra.mxu0 %v1939_v50  ;;  %v1978_v50 = vld [vmem:[#allocation7 + $0x64] ss:$8 sps:$4 sm:$0xff]  }
  0x4b   :  { %404 = vmatpush1.bf16.msra.mxu1 %v1890_v16  ;;  %617 = vmatprep.subr.bf16.mxu0 %v1940_v51  ;;  %v1954_v16 = vld [vmem:[#allocation2 + $0xa0] ss:$8 sps:$4 sm:$0xff]  }
  0x4c   :  { %405 = vmatprep.subr.bf16.mxu1 %v1895_v17  ;;  %v1955_v17 = vld [vmem:[#allocation2 + $0x94] ss:$8 sps:$4 sm:$0xff]   ;;  %v1976_v51 = vld [vmem:[#allocation7 + $0x60] ss:$8 sps:$4 sm:$0xff]  }
  0x4e   :  { %618 = vmatpush1.bf16.msra.mxu0 %v1942_v52  ;;  %v1981_v52 = vld [vmem:[#allocation7 + $0x54] ss:$8 sps:$4 sm:$0xff]  }
  0x4f   :  { %406 = vmatpush1.bf16.msra.mxu1 %v1893_v18  ;;  %619 = vmatprep.subr.bf16.mxu0 %v1943_v53  ;;  %v1957_v18 = vld [vmem:[#allocation2 + $0x90] ss:$8 sps:$4 sm:$0xff]  }
  0x50   :  { %407 = vmatprep.subr.bf16.mxu1 %v1898_v19  ;;  %v1958_v19 = vld [vmem:[#allocation2 + $0x84] ss:$8 sps:$4 sm:$0xff]   ;;  %v1979_v53 = vld [vmem:[#allocation7 + $0x50] ss:$8 sps:$4 sm:$0xff]  }
  0x52   :  { %620 = vmatpush1.bf16.msra.mxu0 %v1945_v54  ;;  %v1984_v54 = vld [vmem:[#allocation7 + $0x44] ss:$8 sps:$4 sm:$0xff]  }
  0x53   :  { %408 = vmatpush1.bf16.msra.mxu1 %v1896_v20  ;;  %621 = vmatprep.subr.bf16.mxu0 %v1946_v55  ;;  %v1960_v20 = vld [vmem:[#allocation2 + $0x80] ss:$8 sps:$4 sm:$0xff]  }
  0x54   :  { %409 = vmatprep.subr.bf16.mxu1 %v1901_v21  ;;  %v1961_v21 = vld [vmem:[#allocation5 + $0x38] sm:$0xff]   ;;  %v1982_v55 = vld [vmem:[#allocation7 + $0x40] ss:$8 sps:$4 sm:$0xff]  }
  0x56   :  { %622 = vmatpush1.bf16.msra.mxu0 %v1948_v56  ;;  %v1987_v56 = vld [vmem:[#allocation7 + $0x34] ss:$8 sps:$4 sm:$0xff]  }
  0x57   :  { %410 = vmatpush1.bf16.msra.mxu1 %v1899_v22  ;;  %631 = vmatprep.subr.bf16.mxu0 %v1949_v57  ;;  %v1962_v22 = vld [vmem:[#allocation5 + $0x30] sm:$0xff]   ;;  %v1990_v57 = vld [vmem:[#allocation7 + $0x24] ss:$8 sps:$4 sm:$0xff]  }
  0x58   :  { %411 = vmatprep.subr.bf16.mxu1 %v1904_v23  ;;  %v1963_v23 = vld [vmem:[#allocation5 + $0x28] sm:$0xff]  }
  0x5a   :  { %632 = vmatpush2.bf16.msra.mxu0 %v1951_v58  ;;  %v1988_v58 = vld [vmem:[#allocation7 + $0x20] ss:$8 sps:$4 sm:$0xff]  }
  0x5b   :  { %412 = vmatpush1.bf16.msra.mxu1 %v1902_v24  ;;  %633 = vmatprep.subr.bf16.mxu0 %v1952_v59  ;;  %v1964_v24 = vld [vmem:[#allocation5 + $0x20] sm:$0xff]  }
  0x5c   :  { %413 = vmatprep.subr.bf16.mxu1 %v1907_v25  ;;  %v1965_v25 = vld [vmem:[#allocation5 + $0x18] sm:$0xff]   ;;  %v470_v59 = vld [vmem:[%s2723_s6] sm:$0x3] }
  0x5d   :  { %v477_v60 = vrot.slane %v470_v59, %v2417_v62  ;;  %v481_v61 = vrot.slane %v470_v59, %v2422_v1  ;;  %v2050_v59 = vld [vmem:[%s2730_s13 + $0x64] ss:$8 sps:$4 sm:$0xff]  }
  0x5e   :  { %634 = vmatpush2.bf16.msra.mxu0 %v1954_v16  ;;  %v1994_v16 = vld [vmem:[#allocation7] ss:$8 sps:$4 sm:$0xff]  }
  0x5f   :  { %414 = vmatpush1.bf16.msra.mxu1 %v1905_v27  ;;  %635 = vmatprep.subr.bf16.mxu0 %v1955_v17  ;;  %v1967_v27 = vld [vmem:[#allocation5 + $0x8] sm:$0xff]   ;;  %v1999_v17 = vld [vmem:[%s2728_s11 + $0x74] ss:$8 sps:$4 sm:$0xff]  }
  0x60   :  { %1703 = vmatprep.subr.msk.bf16.mxu1 %vm392_vm1, %v1702_v28  ;;  %v1968_v28 = vld [vmem:[#allocation5] sm:$0xff]  }
  0x62   :  { %636 = vmatpush2.bf16.msra.mxu0 %v1957_v18  ;;  %v1730_v18 = vld [vmem:[%s2725_s8] ss:$0 sm:$0xff] }
  0x63   :  { %420 = vmatpush2.bf16.msra.mxu1 %v394_v31  ;;  %637 = vmatprep.subr.bf16.mxu0 %v1958_v19 }
  0x64   :  { %421 = vmatprep.subr.bf16.mxu1 %v1912_v30  ;;  %v239_v30 = vld [vmem:[%s2721_s4] sm:$0x3] }
  0x65   :  { %v246_v31 = vrot.slane %v239_v30, %v2417_v62 }
  0x66   :  { %638 = vmatpush2.bf16.msra.mxu0 %v1960_v20 }
  0x67   :  { %422 = vmatpush2.bf16.msra.mxu1 %v1910_v32  ;;  %v250_v32 = vrot.slane %v239_v30, %v2422_v1  ;;  %914 = vmatprep.subr.bf16.mxu0 %v1975_v49  ;;  %v2005_v30 = vld [vmem:[%s2728_s11 + $0x54] ss:$8 sps:$4 sm:$0xff]   ;;  %v2030_v49 = vld [vmem:[%s2728_s11 + $0xc0] ss:$8 sps:$4 sm:$0xff]  }
  0x68   :  { %423 = vmatprep.subr.bf16.mxu1 %v1915_v33 }
  0x6b   :  { %424 = vmatpush2.bf16.msra.mxu1 %v1913_v34 }
  0x6c   :  { %425 = vmatprep.subr.bf16.mxu1 %v1918_v35 }
  0x6f   :  { %426 = vmatpush2.bf16.msra.mxu1 %v1916_v36 }
  0x70   :  { %427 = vmatprep.subr.bf16.mxu1 %v1921_v37 }
  0x73   :  { %428 = vmatpush2.bf16.msra.mxu1 %v1919_v38 }
  0x74   :  { %429 = vmatprep.subr.bf16.mxu1 %v1924_v39 }
  0x77   :  { %430 = vmatpush2.bf16.msra.mxu1 %v1922_v40 }
  0x78   :  { %762 = vmatprep.subr.bf16.mxu1 %v2205_v0 }
 0x102   :  { %v199_v4 = vpop.f32.mrf.mxu1 }
 0x103   :  { %v200_v5 = vadd.f32 %v199_v4, %v114_v2 }
 0x104   :  { %v201_v6 = vpop.f32.mrf.mxu1 }
 0x105   :  { %vm206_vm2 = vcmp.gt.f32.partialorder %v200_v5, 0.0  ;;  %v208_v7 = vmul.f32 0.2, %v200_v5  ;;  %v202_v8 = vadd.f32 %v201_v6, %v118_v3 }
 0x106   :  { %v203_v9 = vpop.f32.mrf.mxu1 }
 0x107   :  { %vm207_vm3 = vcmp.gt.f32.partialorder %v202_v8, 0.0  ;;  %v209_v10 = vmul.f32 0.2, %v202_v8  ;;  %v210_v11 = vsel %vm206_vm2, %v200_v5, %v208_v7 }
 0x108   :  { %v204_v12 = vpop.f32.mrf.mxu1  ;;  %v240_v15 = vpack.c.bf16 %v210_v11, %v210_v11 }
 0x109   :  { %v211_v13 = vsel %vm207_vm3, %v202_v8, %v209_v10 }
 0x10a   :  { %v241_v14 = vpack.c.bf16 %v211_v13, %v211_v13  ;;  %v1993_v13 = vld [vmem:[#allocation7 + $0x14] ss:$8 sps:$4 sm:$0xff]  }
 0x10c   :  { %1704 = vmatprep.mubr.msk.bf16.mxu1 %vm388_vm4, %v241_v14  ;;  %v1991_v14 = vld [vmem:[#allocation7 + $0x10] ss:$8 sps:$4 sm:$0xff]  }
 0x10d   :  { %432 = vmatmul.mubr.bf16.vlgmr.msra.gmra.mxu1 %v240_v15  ;;  %v1996_v15 = vld [vmem:[#allocation7 + $0x4] ss:$8 sps:$4 sm:$0xff]  }
 0x10e   :  { %763 = vmatpush1.bf16.msra.mxu1 %v1961_v21 }
 0x10f   :  { %764 = vmatprep.subr.bf16.mxu1 %v2205_v0 }
 0x112   :  { %765 = vmatpush1.bf16.msra.mxu1 %v1962_v22 }
 0x113   :  { %766 = vmatprep.subr.bf16.mxu1 %v2205_v0 }
 0x116   :  { %767 = vmatpush1.bf16.msra.mxu1 %v1963_v23 }
 0x117   :  { %768 = vmatprep.subr.bf16.mxu1 %v2205_v0 }
 0x11a   :  { %769 = vmatpush1.bf16.msra.mxu1 %v1964_v24 }
 0x11b   :  { %770 = vmatprep.subr.bf16.mxu1 %v2205_v0 }
 0x11e   :  { %771 = vmatpush1.bf16.msra.mxu1 %v1965_v25  ;;  %v1997_v25 = vld [vmem:[%s2728_s11 + $0x70] ss:$8 sps:$4 sm:$0xff]  }
 0x11f   :  { %772 = vmatprep.subr.bf16.mxu1 %v2205_v0 }
 0x122   :  { %773 = vmatpush1.bf16.msra.mxu1 %v1966_v26 }
 0x123   :  { %774 = vmatprep.subr.bf16.mxu1 %v2205_v0 }
 0x126   :  { %775 = vmatpush1.bf16.msra.mxu1 %v1967_v27 }
 0x127   :  { %776 = vmatprep.subr.bf16.mxu1 %v2205_v0 }
 0x12a   :  { %777 = vmatpush1.bf16.msra.mxu1 %v1968_v28  ;;  %v2002_v28 = vld [vmem:[%s2728_s11 + $0x64] ss:$8 sps:$4 sm:$0xff]  }
 0x12b   :  { %786 = vmatprep.subr.bf16.mxu1 %v2205_v0 }
 0x12e   :  { %787 = vmatpush2.bf16.msra.mxu1 %v1969_v29  ;;  %v2000_v29 = vld [vmem:[%s2728_s11 + $0x60] ss:$8 sps:$4 sm:$0xff]  }
 0x12f   :  { %788 = vmatprep.subr.bf16.mxu1 %v2205_v0 }
 0x132   :  { %789 = vmatpush2.bf16.msra.mxu1 %v1970_v45  ;;  %v2024_v45 = vld [vmem:[%s2728_s11 + $0xe0] ss:$8 sps:$4 sm:$0xff]  }
 0x133   :  { %790 = vmatprep.subr.bf16.mxu1 %v2205_v0 }
 0x136   :  { %791 = vmatpush2.bf16.msra.mxu1 %v1971_v46  ;;  %v2029_v46 = vld [vmem:[%s2728_s11 + $0xd4] ss:$8 sps:$4 sm:$0xff]  }
 0x137   :  { %792 = vmatprep.subr.bf16.mxu1 %v2205_v0 }
 0x13a   :  { %793 = vmatpush2.bf16.msra.mxu1 %v1972_v47  ;;  %v2027_v47 = vld [vmem:[%s2728_s11 + $0xd0] ss:$8 sps:$4 sm:$0xff]  }
 0x1cd   :  { %v433_v33 = vpop.f32.mrf.mxu1 }
 0x1ce   :  { %v434_v34 = vadd.f32 %v433_v33, %v246_v31  ;;  %v2003_v31 = vld [vmem:[%s2728_s11 + $0x50] ss:$8 sps:$4 sm:$0xff]   ;;  %v2006_v33 = vld [vmem:[%s2728_s11 + $0x40] ss:$8 sps:$4 sm:$0xff]  }
 0x1cf   :  { %v435_v35 = vpop.f32.mrf.mxu1 }
 0x1d0   :  { %vm440_vm5 = vcmp.gt.f32.partialorder %v434_v34, 0.0  ;;  %v442_v36 = vmul.f32 0.2, %v434_v34  ;;  %v436_v37 = vadd.f32 %v435_v35, %v250_v32  ;;  %v2008_v32 = vld [vmem:[%s2728_s11 + $0x44] ss:$8 sps:$4 sm:$0xff]  }
 0x1d1   :  { %v437_v38 = vpop.f32.mrf.mxu1  ;;  %v2009_v35 = vld [vmem:[%s2728_s11 + $0x30] ss:$8 sps:$4 sm:$0xff]  }
 0x1d2   :  { %v443_v39 = vmul.f32 0.2, %v436_v37  ;;  %vm441_vm6 = vcmp.gt.f32.partialorder %v436_v37, 0.0  ;;  %v444_v41 = vsel %vm440_vm5, %v434_v34, %v442_v36  ;;  %v2011_v34 = vld [vmem:[%s2728_s11 + $0x34] ss:$8 sps:$4 sm:$0xff]  }
 0x1d3   :  { %v438_v40 = vpop.f32.mrf.mxu1  ;;  %v471_v44 = vpack.c.bf16 %v444_v41, %v444_v41  ;;  %v2014_v36 = vld [vmem:[%s2728_s11 + $0x24] ss:$8 sps:$4 sm:$0xff]   ;;  %v2017_v38 = vld [vmem:[%s2728_s11 + $0x14] ss:$8 sps:$4 sm:$0xff]   ;;  %v2018_v41 = vld [vmem:[%s2728_s11] ss:$8 sps:$4 sm:$0xff]  }
 0x1d4   :  { %v445_v42 = vsel %vm441_vm6, %v436_v37, %v443_v39  ;;  %v2012_v37 = vld [vmem:[%s2728_s11 + $0x20] ss:$8 sps:$4 sm:$0xff]   ;;  %v2015_v39 = vld [vmem:[%s2728_s11 + $0x10] ss:$8 sps:$4 sm:$0xff]   ;;  %v2020_v40 = vld [vmem:[%s2728_s11 + $0x4] ss:$8 sps:$4 sm:$0xff]  }
 0x1d5   :  { %v472_v43 = vpack.c.bf16 %v445_v42, %v445_v42  ;;  %v2023_v42 = vld [vmem:[%s2728_s11 + $0xf4] ss:$8 sps:$4 sm:$0xff]  }
 0x1d7   :  { %1729 = vmatprep.mubr.msk.bf16.mxu0 %vm161_vm0, %v472_v43  ;;  %v2021_v43 = vld [vmem:[%s2728_s11 + $0xf0] ss:$8 sps:$4 sm:$0xff]  }
 0x1d8   :  { %640 = vmatmul.mubr.bf16.vlgmr.msra.gmra.mxu0 %v471_v44  ;;  %v2026_v44 = vld [vmem:[%s2728_s11 + $0xe4] ss:$8 sps:$4 sm:$0xff]  }
 0x1d9   :  { %946 = vmatprep.mubr.bf16.mxu0 %v2205_v0  ;;  %915 = vmatpush1.bf16.msra.mxu0 %v1973_v48  ;;  %v1985_v0 = vld [vmem:[#allocation7 + $0x30] ss:$8 sps:$4 sm:$0xff]   ;;  %v2032_v48 = vld [vmem:[%s2728_s11 + $0xc4] ss:$8 sps:$4 sm:$0xff]  }
 0x1da   :  { %916 = vmatprep.subr.bf16.mxu0 %v1978_v50  ;;  %v2035_v50 = vld [vmem:[%s2728_s11 + $0xb4] ss:$8 sps:$4 sm:$0xff]  }
 0x1dd   :  { %917 = vmatpush1.bf16.msra.mxu0 %v1976_v51  ;;  %v2033_v51 = vld [vmem:[%s2728_s11 + $0xb0] ss:$8 sps:$4 sm:$0xff]  }
 0x1de   :  { %918 = vmatprep.subr.bf16.mxu0 %v1981_v52  ;;  %v2038_v52 = vld [vmem:[%s2728_s11 + $0xa4] ss:$8 sps:$4 sm:$0xff]  }
 0x1e1   :  { %919 = vmatpush1.bf16.msra.mxu0 %v1979_v53  ;;  %v2036_v53 = vld [vmem:[%s2728_s11 + $0xa0] ss:$8 sps:$4 sm:$0xff]  }
 0x1e2   :  { %920 = vmatprep.subr.bf16.mxu0 %v1984_v54  ;;  %v2041_v54 = vld [vmem:[%s2728_s11 + $0x94] ss:$8 sps:$4 sm:$0xff]  }
 0x1e5   :  { %921 = vmatpush1.bf16.msra.mxu0 %v1982_v55  ;;  %v2039_v55 = vld [vmem:[%s2728_s11 + $0x90] ss:$8 sps:$4 sm:$0xff]  }
 0x1e6   :  { %922 = vmatprep.subr.bf16.mxu0 %v1987_v56  ;;  %v2044_v56 = vld [vmem:[%s2728_s11 + $0x84] ss:$8 sps:$4 sm:$0xff]  }
 0x1e9   :  { %923 = vmatpush1.bf16.msra.mxu0 %v1985_v0  ;;  %v2042_v0 = vld [vmem:[%s2728_s11 + $0x80] ss:$8 sps:$4 sm:$0xff]   ;;  %s1656_s11 = sshll.u32 %s2206_s24, 4  ;;  %s1657_s11 = int_to_ptr.vmem [resolvable:$true] %s1656_s11 }
 0x1ea   :  { %924 = vmatprep.subr.bf16.mxu0 %v1990_v57  ;;  %v2045_v57 = vld [vmem:[%s2730_s13 + $0x70] ss:$8 sps:$4 sm:$0xff]   ;;  %p2177_p2 = scmp.lt.s32.totalorder %s1657_s11, %s1657_s11 }
 0x1ed   :  { %925 = vmatpush1.bf16.msra.mxu0 %v1988_v58  ;;  %v2047_v58 = vld [vmem:[%s2730_s13 + $0x74] ss:$8 sps:$4 sm:$0xff]  }
 0x1ee   :  { %926 = vmatprep.subr.bf16.mxu0 %v1993_v13  ;;  %1420 = vmatprep.subr.bf16.mxu1 %v2047_v58  ;;  %v2069_v13 = vld [vmem:[%s2730_s13 + $0xf0] ss:$8 sps:$4 sm:$0xff]  }
 0x1f1   :  { %927 = vmatpush1.bf16.msra.mxu0 %v1991_v14  ;;  %v2074_v14 = vld [vmem:[%s2730_s13 + $0xe4] ss:$8 sps:$4 sm:$0xff]  }
 0x1f2   :  { %928 = vmatprep.subr.bf16.mxu0 %v1996_v15  ;;  %v2072_v15 = vld [vmem:[%s2730_s13 + $0xe0] ss:$8 sps:$4 sm:$0xff]  }
 0x1f5   :  { %929 = vmatpush1.bf16.msra.mxu0 %v1994_v16  ;;  %v2077_v16 = vld [vmem:[%s2730_s13 + $0xd4] ss:$8 sps:$4 sm:$0xff]  }
 0x1f6   :  { %1167 = vmatprep.subr.bf16.mxu0 %v1999_v17  ;;  %v2075_v17 = vld [vmem:[%s2730_s13 + $0xd0] ss:$8 sps:$4 sm:$0xff]  }
 0x298   :  { %v641_v63 = vpop.f32.mrf.mxu0 }
 0x299   :  { %v642_v2 = vadd.f32 %v641_v63, %v477_v60  ;;  %v2048_v60 = vld [vmem:[%s2730_s13 + $0x60] ss:$8 sps:$4 sm:$0xff]   ;;  %v2051_v63 = vld [vmem:[%s2730_s13 + $0x50] ss:$8 sps:$4 sm:$0xff]  }
 0x29a   :  { %v643_v3 = vpop.f32.mrf.mxu0 }
 0x29b   :  { %vm648_vm7 = vcmp.gt.f32.partialorder %v642_v2, 0.0  ;;  %v650_v4 = vmul.f32 0.2, %v642_v2  ;;  %v644_v5 = vadd.f32 %v643_v3, %v481_v61  ;;  %v2053_v61 = vld [vmem:[%s2730_s13 + $0x54] ss:$8 sps:$4 sm:$0xff]  }
 0x29c   :  { %v645_v6 = vpop.f32.mrf.mxu0  ;;  %v2054_v3 = vld [vmem:[%s2730_s13 + $0x40] ss:$8 sps:$4 sm:$0xff]  }
 0x29d   :  { %vm649_vm8 = vcmp.gt.f32.partialorder %v644_v5, 0.0  ;;  %v651_v7 = vmul.f32 0.2, %v644_v5  ;;  %v652_v8 = vsel %vm648_vm7, %v642_v2, %v650_v4  ;;  %v2056_v2 = vld [vmem:[%s2730_s13 + $0x44] ss:$8 sps:$4 sm:$0xff]  }
 0x29e   :  { %v646_v9 = vpop.f32.mrf.mxu0  ;;  %v679_v12 = vpack.c.bf16 %v652_v8, %v652_v8  ;;  %v2059_v4 = vld [vmem:[%s2730_s13 + $0x34] ss:$8 sps:$4 sm:$0xff]   ;;  %v2062_v6 = vld [vmem:[%s2730_s13 + $0x24] ss:$8 sps:$4 sm:$0xff]  }
 0x29f   :  { %v653_v10 = vsel %vm649_vm8, %v644_v5, %v651_v7  ;;  %v2057_v5 = vld [vmem:[%s2730_s13 + $0x30] ss:$8 sps:$4 sm:$0xff]   ;;  %v2060_v7 = vld [vmem:[%s2730_s13 + $0x20] ss:$8 sps:$4 sm:$0xff]   ;;  %v2065_v8 = vld [vmem:[%s2730_s13 + $0x14] ss:$8 sps:$4 sm:$0xff]  }
 0x2a0   :  { %v680_v11 = vpack.c.bf16 %v653_v10, %v653_v10  ;;  %v2063_v9 = vld [vmem:[%s2730_s13 + $0x10] ss:$8 sps:$4 sm:$0xff]   ;;  %v2068_v10 = vld [vmem:[%s2730_s13 + $0x4] ss:$8 sps:$4 sm:$0xff]  }
 0x2a2   :  { %1743 = vmatprep.mubr.msk.bf16.mxu1 %vm161_vm0, %v680_v11  ;;  %v2066_v11 = vld [vmem:[%s2730_s13] ss:$8 sps:$4 sm:$0xff]   ;;  %vm1648_vm0 = vcmask 519168  }
 0x2a3   :  { %795 = vmatmul.mubr.bf16.vlgmr.msra.gmra.mxu1 %v679_v12  ;;  %v2071_v12 = vld [vmem:[%s2730_s13 + $0xf4] ss:$8 sps:$4 sm:$0xff]  }
 0x2a4   :  { %1421 = vmatpush1.bf16.msra.mxu1 %v2045_v57 }
 0x2a5   :  { %1422 = vmatprep.subr.bf16.mxu1 %v2050_v59 }
 0x2a8   :  { %1423 = vmatpush1.bf16.msra.mxu1 %v2048_v60 }
 0x2a9   :  { %1424 = vmatprep.subr.bf16.mxu1 %v2053_v61 }
 0x2ac   :  { %1425 = vmatpush1.bf16.msra.mxu1 %v2051_v63 }
 0x2ad   :  { %1426 = vmatprep.subr.bf16.mxu1 %v2056_v2 }
 0x2b0   :  { %1427 = vmatpush1.bf16.msra.mxu1 %v2054_v3 }
 0x2b1   :  { %1428 = vmatprep.subr.bf16.mxu1 %v2059_v4 }
 0x2b4   :  { %1429 = vmatpush1.bf16.msra.mxu1 %v2057_v5 }
 0x2b5   :  { %1430 = vmatprep.subr.bf16.mxu1 %v2062_v6 }
 0x2b8   :  { %1431 = vmatpush1.bf16.msra.mxu1 %v2060_v7  ;;  %v2104_v7 = vld [vmem:[%s2732_s15 + $0x10] sm:$0xff]  }
 0x2b9   :  { %1432 = vmatprep.subr.bf16.mxu1 %v2065_v8  ;;  %v2105_v8 = vld [vmem:[%s2732_s15 + $0x48] sm:$0xff]  }
 0x2bc   :  { %1433 = vmatpush1.bf16.msra.mxu1 %v2063_v9  ;;  %v2106_v9 = vld [vmem:[%s2732_s15 + $0x8] sm:$0xff]  }
 0x2bd   :  { %1434 = vmatprep.subr.bf16.mxu1 %v2068_v10  ;;  %v2107_v10 = vld [vmem:[%s2732_s15 + $0x40] sm:$0xff]  }
 0x2c0   :  { %1435 = vmatpush1.bf16.msra.mxu1 %v2066_v11  ;;  %v2108_v11 = vld [vmem:[%s2732_s15] sm:$0xff]  }
 0x2c1   :  { %1436 = vmatprep.subr.bf16.mxu1 %v2071_v12  ;;  %v1246_v12 = vld [vmem:[%s2731_s14] sm:$0x3] }
 0x2c4   :  { %1437 = vmatpush2.bf16.msra.mxu1 %v2069_v13  ;;  %v1253_v13 = vrot.slane %v1246_v12, %v2417_v62 }
 0x2c5   :  { %1438 = vmatprep.subr.bf16.mxu1 %v2074_v14  ;;  %v1257_v14 = vrot.slane %v1246_v12, %v2422_v1 }
 0x2c8   :  { %1439 = vmatpush2.bf16.msra.mxu1 %v2072_v15 }
 0x2c9   :  { %1440 = vmatprep.subr.bf16.mxu1 %v2077_v16 }
 0x2cc   :  { %1441 = vmatpush2.bf16.msra.mxu1 %v2075_v17 }
 0x363   :  { %v796_v19 = vpop.f32.mrf.mxu1 }
 0x364   :  { %v797_v20 = vadd.f32 %v1730_v18, %v796_v19  ;;  %v2080_v18 = vld [vmem:[%s2730_s13 + $0xc4] ss:$8 sps:$4 sm:$0xff]   ;;  %v2078_v19 = vld [vmem:[%s2730_s13 + $0xc0] ss:$8 sps:$4 sm:$0xff]  }
 0x365   :  { %v798_v21 = vpop.f32.mrf.mxu1  ;;  %1442 = vmatprep.subr.bf16.mxu1 %v2080_v18 }
 0x366   :  { %vm802_vm9 = vcmp.gt.f32.partialorder %v797_v20, 0.0  ;;  %v803_v22 = vmul.f32 0.2, %v797_v20  ;;  %1443 = vmatpush2.bf16.msra.mxu1 %v2078_v19  ;;  %v2081_v21 = vld [vmem:[%s2730_s13 + $0xb0] ss:$8 sps:$4 sm:$0xff]  }
 0x367   :  { %v799_v23 = vpop.f32.mrf.mxu1 }
 0x368   :  { %v804_v24 = vsel %vm802_vm9, %v797_v20, %v803_v22  ;;  %v2083_v20 = vld [vmem:[%s2730_s13 + $0xb4] ss:$8 sps:$4 sm:$0xff]   ;;  %v2086_v22 = vld [vmem:[%s2730_s13 + $0xa4] ss:$8 sps:$4 sm:$0xff]   ;;  %v2084_v23 = vld [vmem:[%s2730_s13 + $0xa0] ss:$8 sps:$4 sm:$0xff]  }
 0x369   :  { %v822_v26 = vpack.c.bf16 %v804_v24, %v804_v24  ;;  %v800_v27 = vpop.f32.mrf.mxu1  ;;  %1444 = vmatprep.subr.bf16.mxu1 %v2083_v20  ;;  %v821_v24 = vld [vmem:[%s2727_s10] sm:$0x3] }
 0x36a   :  { %1445 = vmatpush2.bf16.msra.mxu1 %v2081_v21 }
 0x36b   :  { %947 = vmatmul.mubr.bf16.vlgmr.msra.gmra.mxu0 %v822_v26  ;;  %1446 = vmatprep.subr.bf16.mxu1 %v2086_v22  ;;  %v831_v26 = vrot.slane %v821_v24, %v2422_v1 }
 0x36c   :  { %1168 = vmatpush1.bf16.msra.mxu0 %v1997_v25  ;;  %v827_v25 = vrot.slane %v821_v24, %v2417_v62 }
 0x36d   :  { %1169 = vmatprep.subr.bf16.mxu0 %v2002_v28 }
 0x36e   :  { %1447 = vmatpush2.bf16.msra.mxu1 %v2084_v23 }
 0x370   :  { %1170 = vmatpush1.bf16.msra.mxu0 %v2000_v29 }
 0x371   :  { %1171 = vmatprep.subr.bf16.mxu0 %v2005_v30 }
 0x374   :  { %1172 = vmatpush1.bf16.msra.mxu0 %v2003_v31 }
 0x375   :  { %1173 = vmatprep.subr.bf16.mxu0 %v2008_v32 }
 0x378   :  { %1174 = vmatpush1.bf16.msra.mxu0 %v2006_v33 }
 0x379   :  { %1175 = vmatprep.subr.bf16.mxu0 %v2011_v34 }
 0x37c   :  { %1176 = vmatpush1.bf16.msra.mxu0 %v2009_v35 }
 0x37d   :  { %1177 = vmatprep.subr.bf16.mxu0 %v2014_v36 }
 0x380   :  { %1178 = vmatpush1.bf16.msra.mxu0 %v2012_v37 }
 0x381   :  { %1179 = vmatprep.subr.bf16.mxu0 %v2017_v38 }
 0x384   :  { %1180 = vmatpush1.bf16.msra.mxu0 %v2015_v39  ;;  %v2089_v39 = vld [vmem:[%s2730_s13 + $0x94] ss:$8 sps:$4 sm:$0xff]  }
 0x385   :  { %1181 = vmatprep.subr.bf16.mxu0 %v2020_v40  ;;  %v2087_v40 = vld [vmem:[%s2730_s13 + $0x90] ss:$8 sps:$4 sm:$0xff]   ;;  %1448 = vmatprep.subr.bf16.mxu1 %v2089_v39 }
 0x386   :  { %1449 = vmatpush2.bf16.msra.mxu1 %v2087_v40 }
 0x388   :  { %1182 = vmatpush1.bf16.msra.mxu0 %v2018_v41  ;;  %v2092_v41 = vld [vmem:[%s2730_s13 + $0x84] ss:$8 sps:$4 sm:$0xff]  }
 0x389   :  { %1183 = vmatprep.subr.bf16.mxu0 %v2023_v42  ;;  %v2090_v42 = vld [vmem:[%s2730_s13 + $0x80] ss:$8 sps:$4 sm:$0xff]   ;;  %1450 = vmatprep.subr.bf16.mxu1 %v2092_v41 }
 0x38a   :  { %1451 = vmatpush2.bf16.msra.mxu1 %v2090_v42 }
 0x38c   :  { %1184 = vmatpush2.bf16.msra.mxu0 %v2021_v43  ;;  %v2093_v43 = vld [vmem:[%s2732_s15 + $0x78] sm:$0xff]  }
 0x38d   :  { %1185 = vmatprep.subr.bf16.mxu0 %v2026_v44  ;;  %v2094_v44 = vld [vmem:[%s2732_s15 + $0x38] sm:$0xff]  }
 0x390   :  { %1186 = vmatpush2.bf16.msra.mxu0 %v2024_v45  ;;  %v2095_v45 = vld [vmem:[%s2732_s15 + $0x70] sm:$0xff]  }
 0x391   :  { %1187 = vmatprep.subr.bf16.mxu0 %v2029_v46  ;;  %v2096_v46 = vld [vmem:[%s2732_s15 + $0x30] sm:$0xff]  }
 0x394   :  { %1188 = vmatpush2.bf16.msra.mxu0 %v2027_v47  ;;  %v2097_v47 = vld [vmem:[%s2732_s15 + $0x68] sm:$0xff]  }
 0x395   :  { %1189 = vmatprep.subr.bf16.mxu0 %v2032_v48  ;;  %v2098_v48 = vld [vmem:[%s2732_s15 + $0x28] sm:$0xff]  }
 0x398   :  { %1190 = vmatpush2.bf16.msra.mxu0 %v2030_v49  ;;  %v2099_v49 = vld [vmem:[%s2732_s15 + $0x60] sm:$0xff]  }
 0x399   :  { %1191 = vmatprep.subr.bf16.mxu0 %v2035_v50  ;;  %v2100_v50 = vld [vmem:[%s2732_s15 + $0x20] sm:$0xff]  }
 0x39c   :  { %1192 = vmatpush2.bf16.msra.mxu0 %v2033_v51  ;;  %v2101_v51 = vld [vmem:[%s2732_s15 + $0x58] sm:$0xff]  }
 0x39d   :  { %1193 = vmatprep.subr.bf16.mxu0 %v2038_v52  ;;  %v2102_v52 = vld [vmem:[%s2732_s15 + $0x18] sm:$0xff]  }
 0x3a0   :  { %1194 = vmatpush2.bf16.msra.mxu0 %v2036_v53  ;;  %v2103_v53 = vld [vmem:[%s2732_s15 + $0x50] sm:$0xff]  }
 0x3a1   :  { %1195 = vmatprep.subr.bf16.mxu0 %v2041_v54  ;;  %v993_v54 = vld [vmem:[%s2729_s12] sm:$0x3] }
 0x3a4   :  { %1196 = vmatpush2.bf16.msra.mxu0 %v2039_v55  ;;  %v1000_v55 = vrot.slane %v993_v54, %v2417_v62  ;;  %v1824_v62 = vld [vmem:[%s2733_s16] ss:$0 sm:$0xff]  ;;  %s2172_s16 = scalar_lea.vmem %s1657_s11, 64 }
 0x3a5   :  { %1197 = vmatprep.subr.bf16.mxu0 %v2044_v56  ;;  %v1004_v56 = vrot.slane %v993_v54, %v2422_v1  ;;  %p2173_p1 = scmp.ne.s32.totalorder %s1657_s11, %s2172_s16  ;;  %p2178_p3 = scmp.lt.s32.totalorder %s2172_s16, %s2172_s16 }
 0x3a7   :  { %p2179_p4 = por %p2178_p3, %p2177_p2 }
 0x3a8   :  { %1198 = vmatpush2.bf16.msra.mxu0 %v2042_v0 }
 0x3a9   :  { %1841 = vmatprep.subr.bf16.mxu0 %v2093_v43  ;;  %p2180_p5 = pnand %p2179_p4, %p2173_p1 }
 0x42b   :  { %v948_v27 = vpop.f32.mrf.mxu0 }
 0x42c   :  { %v949_v28 = vadd.f32 %v948_v27, %v827_v25 }
 0x42d   :  { %v950_v29 = vpop.f32.mrf.mxu0 }
 0x42e   :  { %vm955_vm10 = vcmp.gt.f32.partialorder %v949_v28, 0.0  ;;  %v957_v30 = vmul.f32 0.2, %v949_v28  ;;  %v951_v31 = vadd.f32 %v950_v29, %v831_v26 }
 0x42f   :  { %v952_v32 = vpop.f32.mrf.mxu0 }
 0x430   :  { %vm956_vm11 = vcmp.gt.f32.partialorder %v951_v31, 0.0  ;;  %v958_v33 = vmul.f32 0.2, %v951_v31  ;;  %v959_v34 = vsel %vm955_vm10, %v949_v28, %v957_v30  ;;  %v2111_v32 = vld [vmem:[%s2740_s27] sm:$0xf] }
 0x431   :  { %v953_v35 = vpop.f32.mrf.mxu0  ;;  %v994_v38 = vpack.c.bf16 %v959_v34, %v959_v34 }
 0x432   :  { %v960_v36 = vsel %vm956_vm11, %v951_v31, %v958_v33 }
 0x433   :  { %v995_v37 = vpack.c.bf16 %v960_v36, %v960_v36 }
 0x435   :  { %1199 = vmatprep.mubr.bf16.mxu0 %v995_v37 }
 0x436   :  { %1200 = vmatmul.mubr.bf16.vlgmr.msra.gmra.mxu0 %v994_v38 }
 0x437   :  { %1842 = vmatpush3.bf16.msra.mxu0 %v2094_v44 }
 0x438   :  { %1843 = vmatprep.subr.bf16.mxu0 %v2095_v45 }
 0x43b   :  { %1844 = vmatpush3.bf16.msra.mxu0 %v2096_v46 }
 0x43c   :  { %1845 = vmatprep.subr.bf16.mxu0 %v2097_v47 }
 0x43f   :  { %1846 = vmatpush3.bf16.msra.mxu0 %v2098_v48 }
 0x440   :  { %1847 = vmatprep.subr.bf16.mxu0 %v2099_v49 }
 0x443   :  { %1848 = vmatpush3.bf16.msra.mxu0 %v2100_v50 }
 0x444   :  { %1849 = vmatprep.subr.bf16.mxu0 %v2101_v51 }
 0x447   :  { %1850 = vmatpush3.bf16.msra.mxu0 %v2102_v52 }
 0x448   :  { %1851 = vmatprep.subr.bf16.mxu0 %v2103_v53 }
 0x44b   :  { %1852 = vmatpush3.bf16.msra.mxu0 %v2104_v7 }
 0x44c   :  { %1853 = vmatprep.subr.bf16.mxu0 %v2105_v8 }
 0x44f   :  { %1854 = vmatpush3.bf16.msra.mxu0 %v2106_v9 }
 0x450   :  { %1855 = vmatprep.subr.bf16.mxu0 %v2107_v10 }
 0x453   :  { %1856 = vmatpush3.bf16.msra.mxu0 %v2108_v11 }
 0x4f6   :  { %v1201_v0 = vpop.f32.mrf.mxu0 }
 0x4f7   :  { %v1202_v57 = vadd.f32 %v1201_v0, %v1000_v55 }
 0x4f8   :  { %v1203_v58 = vpop.f32.mrf.mxu0 }
 0x4f9   :  { %vm1208_vm12 = vcmp.gt.f32.partialorder %v1202_v57, 0.0  ;;  %v1210_v59 = vmul.f32 0.2, %v1202_v57  ;;  %v1204_v60 = vadd.f32 %v1203_v58, %v1004_v56 }
 0x4fa   :  { %v1205_v61 = vpop.f32.mrf.mxu0 }
 0x4fb   :  { %vm1209_vm13 = vcmp.gt.f32.partialorder %v1204_v60, 0.0  ;;  %v1211_v63 = vmul.f32 0.2, %v1204_v60  ;;  %v1212_v2 = vsel %vm1208_vm12, %v1202_v57, %v1210_v59 }
 0x4fc   :  { %v1206_v3 = vpop.f32.mrf.mxu0  ;;  %v1247_v6 = vpack.c.bf16 %v1212_v2, %v1212_v2 }
 0x4fd   :  { %v1213_v4 = vsel %vm1209_vm13, %v1204_v60, %v1211_v63 }
 0x4fe   :  { %v1248_v5 = vpack.c.bf16 %v1213_v4, %v1213_v4 }
 0x500   :  { %1452 = vmatprep.mubr.bf16.mxu1 %v1248_v5 }
 0x501   :  { %1453 = vmatmul.mubr.bf16.vlgmr.msra.gmra.mxu1 %v1247_v6 }
 0x5c1   :  { %v1454_v15 = vpop.f32.mrf.mxu1 }
 0x5c2   :  { %v1455_v16 = vadd.f32 %v1454_v15, %v1253_v13 }
 0x5c3   :  { %v1456_v17 = vpop.f32.mrf.mxu1 }
 0x5c4   :  { %vm1461_vm14 = vcmp.gt.f32.partialorder %v1455_v16, 0.0  ;;  %v1463_v18 = vmul.f32 0.2, %v1455_v16  ;;  %v1457_v19 = vadd.f32 %v1456_v17, %v1257_v14 }
 0x5c5   :  { %v1458_v20 = vpop.f32.mrf.mxu1 }
 0x5c6   :  { %vm1462_vm15 = vcmp.gt.f32.partialorder %v1457_v19, 0.0  ;;  %v1464_v21 = vmul.f32 0.2, %v1457_v19  ;;  %v1465_v22 = vsel %vm1461_vm14, %v1455_v16, %v1463_v18 }
 0x5c7   :  { %v1459_v23 = vpop.f32.mrf.mxu1  ;;  %v1500_v26 = vpack.c.bf16 %v1465_v22, %v1465_v22 }
 0x5c8   :  { %v1466_v24 = vsel %vm1462_vm15, %v1457_v19, %v1464_v21 }
 0x5c9   :  { %v1501_v25 = vpack.c.bf16 %v1466_v24, %v1466_v24 }
 0x5cb   :  { %1636 = vmatprep.mubr.bf16.mxu0 %v1501_v25 }
 0x5cc   :  { %1637 = vmatmul.mubr.bf16.vlgmr.msra.gmra.mxu0 %v1500_v26 }
 0x68c   :  { %v1857_v27 = vpop.f32.mrf.mxu0 }
 0x68e   :  { %v1858_v1 = vpop.f32.mrf.mxu0 }
 0x68f   :  { %v1859_v28 = vadd.f32 %v1858_v1, %v1857_v27 }
 0x690   :  { %v1860_v29 = vpop.f32.mrf.mxu0 }
 0x691   :  { %v1639_v30 = vadd.f32 %v1859_v28, %v1824_v62 }
 0x692   :  { %v1861_v31 = vpop.f32.mrf.mxu0 }
 0x693   :  { %v1644_v33 = vadd.f32 %v2111_v32, %v1639_v30 }
 0x695   :  { %v1645_v34 = vmul.f32 100.0, %v1644_v33 }
 0x697   :  { %2109 = vtanh.f32 %v1645_v34 }
 0x6a4   :  { %v2110_v35 = vpop.eup %2109 }
 0x6a5   :  { %v1647_v36 = vmul.f32 1.05, %v2110_v35 }
 0x6a7   :  { %1649 = vst.msk [vmem:[#allocation8] sm:$0xf] %vm1648_vm0, %v1647_v36 }
 0x6a8   :  { %2183 = shalt.err (!%p2180_p5)
}
 0x6a9   :  { %1659 = dma.vmem_to_hbm [thread:$0]  %s1657_s11, 64, %s2734_s17, [#allocation4]  }
 0x6aa   :  { %2196 = dma.done.wait [#allocation4], 64  }
 0x6ab   :  { %2197 = vsyncadd [#allocation4], 4294967232 }
 0x6ac   :  { %1663 = vsyncpa [#allocation3], 1 }
 0x6ad   :  { %1664 = vsyncpa [#allocation6], 1 }
 0x6ae   :  { %1665 = vsyncpa [#allocation4], 1 }

</bundles_post_ra>
